<compile_context>
chip_gen: v6e
topology: v6e:2x2x1
jax: 0.10.0
libtpu: 0.0.40
codegen_flags: <defaults>
</compile_context>

<pallas_src>
import math
from functools import partial

import numpy as np
import jax
import jax.numpy as jnp
from jax import lax
from jax.experimental import pallas as pl
from jax.experimental.pallas import tpu as pltpu


# ----------------------------------------------------------------------------
# Small helpers
# ----------------------------------------------------------------------------

def _fixed_spec(shape):
    """Full-array block whose index_map ignores the (rank-1) grid index."""
    nd = len(shape)

    def idx(i):
        return (0,) * nd

    return pl.BlockSpec(tuple(shape), idx)


def _dot(a, b):
    """bf16 x bf16 MXU matmul with f32 accumulation (a @ b)."""
    return lax.dot_general(a.astype(jnp.bfloat16), b.astype(jnp.bfloat16),
                           (((1,), (0,)), ((), ())),
                           preferred_element_type=jnp.float32)


def _dot_nt(a, b):
    """a @ b.T via dot_general contracting dim 1 of both operands (no relayout)."""
    return lax.dot_general(a.astype(jnp.bfloat16), b.astype(jnp.bfloat16),
                           (((1,), (1,)), ((), ())),
                           preferred_element_type=jnp.float32)


# ----------------------------------------------------------------------------
# Kernel 1: linear + tanh (goal text encoder projection)
# ----------------------------------------------------------------------------

def _linear_tanh_kernel(x_ref, w_ref, b_ref, o_ref):
    y = _dot(x_ref[...], w_ref[...]) + b_ref[...]
    o_ref[...] = jnp.tanh(y).astype(o_ref.dtype)


def linear_tanh(x, w, b):
    M, K = x.shape
    N = w.shape[1]
    return pl.pallas_call(
        _linear_tanh_kernel,
        grid=(1,),
        in_specs=[_fixed_spec((M, K)), _fixed_spec((K, N)), _fixed_spec((1, N))],
        out_specs=_fixed_spec((M, N)),
        out_shape=jax.ShapeDtypeStruct((M, N), jnp.bfloat16),
    )(x, w, b)


# ----------------------------------------------------------------------------
# Kernel 2/3: encoder projection fused with the layer-concatenated K projection
# ----------------------------------------------------------------------------

def _encode_project_kernel(x_ref, w_ref, b_ref, wk_ref, feat_ref, k_ref):
    feat = jnp.tanh(_dot(x_ref[...], w_ref[...]) + b_ref[...])     # f32
    feat_bf = feat.astype(jnp.bfloat16)
    feat_ref[...] = feat_bf
    # K projection for ALL graph layers in one wide-N matmul (layer-concatenated)
    k_ref[...] = _dot(feat_bf, wk_ref[...]).astype(k_ref.dtype)


def cap_encode(tokens, enc_params, wk_cat, n_layers):
    emb = jnp.take(enc_params["emb"], tokens, axis=0)              # [T, L, E] bf16
    T, L, E = emb.shape
    KN = wk_cat.shape[1]
    M = T * L
    feat, kproj = pl.pallas_call(
        _encode_project_kernel,
        grid=(1,),
        in_specs=[_fixed_spec((M, E)), _fixed_spec((E, E)),
                  _fixed_spec((1, E)), _fixed_spec((E, KN))],
        out_specs=(_fixed_spec((M, E)), _fixed_spec((M, KN))),
        out_shape=(jax.ShapeDtypeStruct((M, E), jnp.bfloat16),
                   jax.ShapeDtypeStruct((M, KN), jnp.bfloat16)),
    )(emb.reshape(M, E), enc_params["w"], enc_params["b"], wk_cat)
    cap_feat = feat.reshape(T, L, E)
    k_all = kproj.reshape(T, L, n_layers, E).transpose(2, 0, 1, 3)  # [nl, T, L, E]
    return cap_feat, k_all


def img_encode(images_sel, enc_params, wk_cat, n_layers):
    # images_sel: [T, C, H, W] (NCHW, like PyTorch)
    T, C, H, W = images_sel.shape
    HW = H * W
    rows = T * HW
    x = jnp.asarray(images_sel, jnp.bfloat16).transpose(0, 2, 3, 1).reshape(rows, C)
    E = enc_params["w"].shape[1]
    KN = wk_cat.shape[1]

    # Row-tiled grid (one image's HW rows per step) -> software pipelining.
    if HW % 8 == 0 and T > 1:
        row_tile, grid = HW, (T,)
    else:
        row_tile, grid = rows, (1,)

    feat, kproj = pl.pallas_call(
        _encode_project_kernel,
        grid=grid,
        in_specs=[pl.BlockSpec((row_tile, C), lambda t: (t, 0)),
                  _fixed_spec((C, E)), _fixed_spec((1, E)), _fixed_spec((E, KN))],
        out_specs=(pl.BlockSpec((row_tile, E), lambda t: (t, 0)),
                   pl.BlockSpec((row_tile, KN), lambda t: (t, 0))),
        out_shape=(jax.ShapeDtypeStruct((rows, E), jnp.bfloat16),
                   jax.ShapeDtypeStruct((rows, KN), jnp.bfloat16)),
        compiler_params=pltpu.CompilerParams(dimension_semantics=("parallel",)),
    )(x, enc_params["w"], enc_params["b"], wk_cat)
    img_feat = feat.reshape(T, HW, E)
    k_all = kproj.reshape(T, HW, n_layers, E).transpose(2, 0, 1, 3)  # [nl, T, HW, E]
    return img_feat, k_all


def text_encode(tokens, enc_params):
    emb = jnp.take(enc_params["emb"], tokens, axis=0)              # [N, L, E] bf16
    N, L, E = emb.shape
    feat = linear_tanh(emb.reshape(N * L, E), enc_params["w"], enc_params["b"])
    return feat.reshape(N, L, E)


# ----------------------------------------------------------------------------
# Kernel 4: fused graph encoder, grid over the batch (only goal node differs)
# ----------------------------------------------------------------------------

def _graph_kernel(goal_ref, cap_tok_ref, img_sp_ref, cap_mask_ref, edge_ref,
                  kcap_ref, kimg_ref, w_ref,
                  cap_attn_o, img_attn_o, cap_adj_o, img_adj_o,
                  *, n_layers, scale):
    f32 = jnp.float32
    b = pl.program_id(0)

    goal = goal_ref[pl.ds(b, 1), :].astype(f32)            # [1, E]
    cap_tok = cap_tok_ref[...].astype(f32)                 # [T, L, E]
    img_sp = img_sp_ref[...].astype(f32)                   # [T, HW, E]
    cap_mask = cap_mask_ref[...]                           # [T, L]  f32
    edge = edge_ref[...]                                   # [T+2, T+2] f32

    # Step summaries -> initial node features (only goal node depends on b)
    denom = jnp.maximum(jnp.sum(cap_mask, axis=-1, keepdims=True), 1.0)
    cap_step = jnp.sum(cap_tok * cap_mask[:, :, None], axis=1) / denom   # [T, E]
    img_step = jnp.mean(img_sp, axis=1)                                  # [T, E]

    nodes_cap = jnp.concatenate(
        [goal, jnp.mean(cap_step, axis=0, keepdims=True), cap_step], axis=0)   # [T+2, E]
    nodes_img = jnp.concatenate(
        [goal, jnp.mean(img_step, axis=0, keepdims=True), img_step], axis=0)   # [T+2, E]

    def masked_softmax(scores, mask):
        s = jnp.where(mask > 0.0, scores, -1e9)
        s = s - jnp.max(s, axis=-1, keepdims=True)
        e = jnp.exp(s)
        p = e / jnp.sum(e, axis=-1, keepdims=True)
        # Zero fully-masked rows instead of leaking a uniform distribution.
        has_valid = (jnp.sum(mask, axis=-1, keepdims=True) > 0.0).astype(f32)
        return p * has_valid

    def softmax(scores):
        s = scores - jnp.max(scores, axis=-1, keepdims=True)
        e = jnp.exp(s)
        return e / jnp.sum(e, axis=-1, keepdims=True)

    for l in range(n_layers):                              # static unroll
        wq_tok = w_ref[l, 0]
        wq_sp = w_ref[l, 1]
        wq_nc, wk_nc, wv_nc = w_ref[l, 2], w_ref[l, 3], w_ref[l, 4]
        wq_ni, wk_ni, wv_ni = w_ref[l, 5], w_ref[l, 6], w_ref[l, 7]

        # Per-step caption-token attention: direct per-step scores
        # (no [T, T*L] block-diagonal score matrix / kron mask).
        q_c = _dot(nodes_cap[2:], wq_tok)                  # [T, E]
        k_c = kcap_ref[l].astype(f32)                      # [T, L, E]  (precomputed)
        cap_scores = jnp.sum(q_c[:, None, :] * k_c, axis=-1) * scale   # [T, L]
        cap_attn = masked_softmax(cap_scores, cap_mask)
        cap_attn_o[0, l] = cap_attn

        # Per-step image-spatial attention
        q_i = _dot(nodes_img[2:], wq_sp)                   # [T, E]
        k_i = kimg_ref[l].astype(f32)                      # [T, HW, E] (precomputed)
        img_scores = jnp.sum(q_i[:, None, :] * k_i, axis=-1) * scale   # [T, HW]
        img_attn = softmax(img_scores)
        img_attn_o[0, l] = img_attn

        # Edge-masked node self-attention -> adjacency matrices
        cap_adj = masked_softmax(
            _dot_nt(_dot(nodes_cap, wq_nc), _dot(nodes_cap, wk_nc)) * scale, edge)
        img_adj = masked_softmax(
            _dot_nt(_dot(nodes_img, wq_ni), _dot(nodes_img, wk_ni)) * scale, edge)
        cap_adj_o[0, l] = cap_adj
        img_adj_o[0, l] = img_adj

        # Node update (message passing through adjacency)
        nodes_cap = nodes_cap + _dot(cap_adj, _dot(nodes_cap, wv_nc))
        nodes_img = nodes_img + _dot(img_adj, _dot(nodes_img, wv_ni))


def graph_encode_batched(goal_summary, cap_feat, img_feat, cap_mask, edge_mask,
                         k_cap_all, k_img_all, w_node, n_layers):
    B, E = goal_summary.shape
    T, L, _ = cap_feat.shape
    HW = img_feat.shape[1]
    T2 = T + 2
    scale = 1.0 / math.sqrt(E)

    kernel = partial(_graph_kernel, n_layers=n_layers, scale=scale)
    out_shape = (
        jax.ShapeDtypeStruct((B, n_layers, T, L), jnp.float32),    # caption attn
        jax.ShapeDtypeStruct((B, n_layers, T, HW), jnp.float32),   # image attn
        jax.ShapeDtypeStruct((B, n_layers, T2, T2), jnp.float32),  # caption adjacency
        jax.ShapeDtypeStruct((B, n_layers, T2, T2), jnp.float32),  # image adjacency
    )
    out_specs = (
        pl.BlockSpec((1, n_layers, T, L), lambda b: (b, 0, 0, 0)),
        pl.BlockSpec((1, n_layers, T, HW), lambda b: (b, 0, 0, 0)),
        pl.BlockSpec((1, n_layers, T2, T2), lambda b: (b, 0, 0, 0)),
        pl.BlockSpec((1, n_layers, T2, T2), lambda b: (b, 0, 0, 0)),
    )
    in_specs = [
        _fixed_spec((B, E)),
        _fixed_spec((T, L, E)),
        _fixed_spec((T, HW, E)),
        _fixed_spec((T, L)),
        _fixed_spec((T2, T2)),
        _fixed_spec((n_layers, T, L, E)),
        _fixed_spec((n_layers, T, HW, E)),
        _fixed_spec(tuple(w_node.shape)),
    ]
    cap_attn, img_attn, cap_adj, img_adj = pl.pallas_call(
        kernel,
        grid=(B,),
        in_specs=in_specs,
        out_specs=out_specs,
        out_shape=out_shape,
        compiler_params=pltpu.CompilerParams(dimension_semantics=("parallel",)),
    )(goal_summary, cap_feat, img_feat, cap_mask, edge_mask,
      k_cap_all, k_img_all, w_node)
    return cap_attn, img_attn, cap_adj, img_adj


# ----------------------------------------------------------------------------
# Kernel 5: fused loss (BCE on adjacency vs topology + MSE on attention maps)
# ----------------------------------------------------------------------------

def _loss_kernel(iam_ref, cam_ref, topo_ref, iaw_ref, sdm_ref, caw_ref, agg_ref,
                 o_ref, *, inv_b):
    def bce_sum(p, t):
        p = jnp.clip(p, 1e-6, 1.0 - 1e-6)
        return -jnp.sum(t * jnp.log(p) + (1.0 - t) * jnp.log(1.0 - p))

    iam = iam_ref[...]
    cam = cam_ref[...]
    topo = topo_ref[...]
    iaw = iaw_ref[...]
    sdm = sdm_ref[...]
    caw = caw_ref[...]
    agg = agg_ref[...]

    n_adj = float(topo.shape[-2] * topo.shape[-1])
    n_iaw = float(iaw.shape[-2] * iaw.shape[-1])
    n_caw = float(caw.shape[-2] * caw.shape[-1])

    # sum_b mean_b(x) == sum(x) / elems_per_b  (element count identical per b)
    bce_i = bce_sum(iam, topo) / n_adj
    bce_c = bce_sum(cam, topo) / n_adj
    d_i = iaw - sdm
    d_c = caw - agg
    mse_i = jnp.sum(d_i * d_i) / n_iaw
    mse_c = jnp.sum(d_c * d_c) / n_caw

    total = (bce_i + bce_c + mse_i + mse_c) * inv_b
    o_ref[...] = total * jnp.ones((1, 1), jnp.float32)


def fused_loss(iam, cam, topo, iaw, sdm, caw, agg):
    B = iam.shape[0]
    out = pl.pallas_call(
        partial(_loss_kernel, inv_b=1.0 / B),
        grid=(1,),
        in_specs=[_fixed_spec(iam.shape), _fixed_spec(cam.shape),
                  _fixed_spec(topo.shape), _fixed_spec(iaw.shape),
                  _fixed_spec(sdm.shape), _fixed_spec(caw.shape),
                  _fixed_spec(agg.shape)],
        out_specs=_fixed_spec((1, 1)),
        out_shape=jax.ShapeDtypeStruct((1, 1), jnp.float32),
    )(iam, cam, topo, iaw, sdm, caw, agg)
    return out[0, 0]


# ----------------------------------------------------------------------------
# Forward pass (mirrors BaselineModel.inference / training_process)
# ----------------------------------------------------------------------------

def baseline_forward(params, goal, caption_steps, images, indicator,
                     aggregate_caption_attentions, scale_down_aggregate_attention_maps,
                     topological_graph_matrix):
    B, S = indicator.shape
    batch_step_num = np.asarray(indicator).sum(-1)               # static selection
    actual_total_step_num = int(batch_step_num.sum())
    batch_step_total_num = B * S
    n_layers = int(params["graph_enc"]["n_layers"])

    agg = np.asarray(aggregate_caption_attentions).reshape(B, S, -1)
    sdm = np.asarray(scale_down_aggregate_attention_maps).reshape(B, S, -1)

    # --- repack topological graph matrix (exact PyTorch loop semantics) -----
    topo = jnp.asarray(topological_graph_matrix, jnp.float32)
    batch_topo = jnp.zeros((B, batch_step_total_num, batch_step_total_num), jnp.float32)
    start_idx = 2
    for idx in range(B):
        n = int(batch_step_num[idx])
        batch_topo = batch_topo.at[idx, :2, :2].set(topo[idx, :2, :2])
        batch_topo = batch_topo.at[idx, start_idx:start_idx + n, :2].set(topo[idx, 2:2 + n, :2])
        batch_topo = batch_topo.at[idx, :2, start_idx:start_idx + n].set(topo[idx, :2, 2:2 + n])
        batch_topo = batch_topo.at[idx, start_idx:start_idx + n,
                                   start_idx:start_idx + n].set(topo[idx, 2:2 + n, 2:2 + n])
        start_idx += n

    # --- flatten & select actual problem-solving steps ----------------------
    ind_flat = np.asarray(indicator).reshape(-1)
    sel = np.nonzero(ind_flat == 1)[0]
    cap_flat = np.asarray(caption_steps).reshape(-1, caption_steps.shape[-1])
    img_flat = np.asarray(images).reshape(-1, images.shape[-3], images.shape[-2], images.shape[-1])
    agg_flat = agg.reshape(-1, agg.shape[-1])
    sdm_flat = sdm.reshape(-1, sdm.shape[-1])

    _agg = jnp.asarray(agg_flat[sel], jnp.float32)                # [T, L]
    _sdm = jnp.asarray(sdm_flat[sel], jnp.float32)                # [T, HW]
    batch_agg = jnp.zeros((B, batch_step_total_num, _agg.shape[-1]), jnp.float32)
    batch_agg = batch_agg.at[:, :actual_total_step_num].set(_agg)
    batch_sdm = jnp.zeros((B, batch_step_total_num, _sdm.shape[-1]), jnp.float32)
    batch_sdm = batch_sdm.at[:, :actual_total_step_num].set(_sdm)

    selected_caption_steps = jnp.asarray(cap_flat[sel], jnp.int32)   # [T, L]
    selected_images = img_flat[sel]                                  # [T, C, H, W] (numpy)
    T = int(sel.shape[0])
    cap_emb_mask = (selected_caption_steps > 0).astype(jnp.float32)  # [T, L]

    # --- encoders (fused Pallas kernels) -------------------------------------
    genc = params["graph_enc"]
    goal_feature = text_encode(jnp.asarray(goal, jnp.int32), params["goal_enc"])  # [B, L, E]
    goal_summary = goal_feature[:, 0]                                              # [B, E]
    cap_feature, k_cap_all = cap_encode(selected_caption_steps, params["cap_enc"],
                                        genc["wk_tok_cat"], n_layers)
    img_feature, k_img_all = img_encode(selected_images, params["img_enc"],
                                        genc["wk_sp_cat"], n_layers)

    # --- edge matrix (dense; used directly as an attention mask) ------------
    # TODO(synk): dense_to_sparse / edge_index message passing is replaced by
    # dense edge-masked attention over the same edge matrix.
    edge = np.ones((T + 2, T + 2), np.float32)
    edge[:, 0] = 0
    edge[0, 1] = 0
    edge[1, 1] = 1
    edge[1, 2:] = 0
    for i in range(T):
        edge[i + 2, i + 2] = 0
    edge_mask = jnp.asarray(edge)

    # --- batched graph encoding: ONE kernel, grid over B ----------------------
    _caw, _iaw, _cam, _iam = graph_encode_batched(
        goal_summary, cap_feature, img_feature, cap_emb_mask, edge_mask,
        k_cap_all, k_img_all, genc["w_node"], n_layers)
    # _caw [B, nl, T, L], _iaw [B, nl, T, HW], _cam/_iam [B, nl, T+2, T+2]

    # --- pad into full batch tensors ------------------------------------------
    nl = n_layers
    batch_iaw = jnp.zeros((B, nl, batch_step_total_num, _iaw.shape[3]), jnp.float32)
    batch_iaw = batch_iaw.at[:, :, :T].set(_iaw)
    batch_iam = jnp.zeros((B, nl, batch_step_total_num, batch_step_total_num), jnp.float32)
    batch_iam = batch_iam.at[:, :, :T + 2, :T + 2].set(_iam)
    batch_caw = jnp.zeros((B, nl, batch_step_total_num, _caw.shape[3]), jnp.float32)
    batch_caw = batch_caw.at[:, :, :T].set(_caw)
    batch_cam = jnp.zeros((B, nl, batch_step_total_num, batch_step_total_num), jnp.float32)
    batch_cam = batch_cam.at[:, :, :T + 2, :T + 2].set(_cam)

    # --- fused loss (BCE on adjacency vs topology, MSE on attention maps) ----
    # TODO(synk): the configurable loss zoo (focal/OHEM/ranking/two-stage) is
    # reduced to the default BCE + attention-MSE formulation.
    topo_crop = batch_topo[:, :actual_total_step_num + 2, :actual_total_step_num + 2]
    loss = fused_loss(_iam[:, -1], _cam[:, -1], topo_crop,
                      _iaw[:, -1], _sdm, _caw[:, -1], _agg)

    data = {
        "image_attention_weights": batch_iaw,
        "image_adjacency_matrix": batch_iam,
        "caption_attention_weights": batch_caw,
        "caption_adjacency_matrix": batch_cam,
        "topological_graph_matrix": batch_topo,
        "aggregate_caption_attentions": batch_agg,
        "scale_down_aggregate_attention_maps": batch_sdm,
        "actual_total_step_num": jnp.full((B,), float(actual_total_step_num), jnp.float32),
        "loss": loss,
    }
    return data


# ----------------------------------------------------------------------------
# Deterministic parameter initialization (done ONCE: bf16 MXU weights, f32 bias)
# ----------------------------------------------------------------------------

def init_params(key, vocab, embed, img_channels, graph_layer_num):
    keys = iter(jax.random.split(key, 64))

    def dense(shape):
        # MXU operands are kept in bf16; accumulation stays f32 inside kernels.
        return (0.05 * jax.random.normal(next(keys), shape, jnp.float32)).astype(jnp.bfloat16)

    def text_enc():
        return {"emb": dense((vocab, embed)),
                "w": dense((embed, embed)),
                "b": jnp.zeros((1, embed), jnp.float32)}

    n_node_w = 8   # wq_tok, wq_sp, wq_nc, wk_nc, wv_nc, wq_ni, wk_ni, wv_ni
    w_node = jnp.stack([jnp.stack([dense((embed, embed)) for _ in range(n_node_w)])
                        for _ in range(graph_layer_num)])                 # [nl, 8, E, E]
    # Layer-concatenated K-projection weights (wide-N matmul hoisted out of layers)
    wk_tok_cat = jnp.concatenate([dense((embed, embed)) for _ in range(graph_layer_num)], axis=1)
    wk_sp_cat = jnp.concatenate([dense((embed, embed)) for _ in range(graph_layer_num)], axis=1)

    return {
        "goal_enc": text_enc(),
        "cap_enc": text_enc(),
        "img_enc": {"w": dense((img_channels, embed)),
                    "b": jnp.zeros((1, embed), jnp.float32)},
        "graph_enc": {"w_node": w_node,
                      "wk_tok_cat": wk_tok_cat,   # [E, nl*E]
                      "wk_sp_cat": wk_sp_cat,     # [E, nl*E]
                      "n_layers": graph_layer_num},
    }


# ----------------------------------------------------------------------------
# Main
# ----------------------------------------------------------------------------

if __name__ == "__main__":
    B, S, L, V, E = 2, 4, 8, 32, 32          # batch, steps/sample, seq len, vocab, embed
    C, H, W = 4, 8, 8                        # image channels / spatial
    graph_layer_num = 2                      # TODO(synk): multi-head collapsed to one head

    root = jax.random.PRNGKey(0)
    pkey, dkey = jax.random.split(root)
    params = init_params(pkey, V, E, C, graph_layer_num)

    dkeys = jax.random.split(dkey, 8)
    goal = np.array(jax.random.randint(dkeys[0], (B, L), 1, V), np.int32)
    caption_steps = np.array(jax.random.randint(dkeys[1], (B, S, L), 0, V), np.int32)
    caption_steps[..., 0] = np.maximum(caption_steps[..., 0], 1)   # at least one valid token
    images = np.array(jax.random.uniform(dkeys[2], (B, S, C, H, W)), np.float32)
    aggregate_caption_attentions = np.array(jax.random.uniform(dkeys[3], (B, S, L)), np.float32)
    scale_down_maps = np.array(jax.random.uniform(dkeys[4], (B, S, H, W)), np.float32)
    topological_graph_matrix = np.array(
        np.asarray(jax.random.uniform(dkeys[5], (B, 2 + S, 2 + S))) > 0.5, np.float32)
    indicator = np.array([[1, 1, 1, 0], [1, 1, 0, 0]], np.int32)

    out = baseline_forward(params, goal, caption_steps, images, indicator,
                           aggregate_caption_attentions, scale_down_maps,
                           topological_graph_matrix)
    jax.block_until_ready(out)
    print("KERNEL_OK")
</pallas_src>

<mosaic_0001>
module attributes {stable_mosaic.version = 11 : i64} {
  func.func @_linear_tanh_kernel(%arg0: i32, %arg1: memref<16x32xbf16, #tpu.memory_space<vmem>>, %arg2: memref<32x32xbf16, #tpu.memory_space<vmem>>, %arg3: memref<1x32xf32, #tpu.memory_space<vmem>>, %arg4: memref<16x32xbf16, #tpu.memory_space<vmem>>) attributes {dimension_semantics = [#tpu.dimension_semantics<arbitrary>], iteration_bounds = array<i64: 1>, scalar_prefetch = 0 : i64, scratch_operands = 0 : i64, tpu.core_type = #tpu.core_type<tc>, window_params = [{pipeline_mode = #tpu.pipeline_mode<synchronous>, transform_indices = @transform_0, window_bounds = array<i64: 16, 32>}, {pipeline_mode = #tpu.pipeline_mode<synchronous>, transform_indices = @transform_1, window_bounds = array<i64: 32, 32>}, {pipeline_mode = #tpu.pipeline_mode<synchronous>, transform_indices = @transform_2, window_bounds = array<i64: 1, 32>}, {pipeline_mode = #tpu.pipeline_mode<synchronous>, transform_indices = @transform_3, window_bounds = array<i64: 16, 32>}]} {
    %c0 = arith.constant 0 : index
    %c0_0 = arith.constant 0 : index
    %0 = vector.load %arg1[%c0, %c0_0] : memref<16x32xbf16, #tpu.memory_space<vmem>>, vector<16x32xbf16>
    %c0_1 = arith.constant 0 : index
    %c0_2 = arith.constant 0 : index
    %1 = vector.load %arg2[%c0_1, %c0_2] : memref<32x32xbf16, #tpu.memory_space<vmem>>, vector<32x32xbf16>
    %cst = arith.constant dense<0.000000e+00> : vector<16x32xf32>
    %2 = tpu.matmul %0, %1, %cst {dimension_numbers = #tpu.dot_dimension_numbers<[1], [0], [0], [1], [0, 0, 1, 1], [], []>} : vector<16x32xbf16>, vector<32x32xbf16>, vector<16x32xf32> -> vector<16x32xf32>
    %c0_3 = arith.constant 0 : index
    %c0_4 = arith.constant 0 : index
    %3 = vector.load %arg3[%c0_3, %c0_4] : memref<1x32xf32, #tpu.memory_space<vmem>>, vector<1x32xf32>
    %4 = vector.broadcast %3 : vector<1x32xf32> to vector<16x32xf32>
    %5 = arith.addf %2, %4 : vector<16x32xf32>
    %6 = math.tanh %5 : vector<16x32xf32>
    %7 = arith.truncf %6 : vector<16x32xf32> to vector<16x32xbf16>
    %c0_5 = arith.constant 0 : index
    %c0_6 = arith.constant 0 : index
    %8 = vector.load %arg4[%c0_5, %c0_6] : memref<16x32xbf16, #tpu.memory_space<vmem>>, vector<16x32xbf16>
    tpu.vector_store %arg4[%c0_5, %c0_6], %7 {strides = array<i32>} : memref<16x32xbf16, #tpu.memory_space<vmem>>, vector<16x32xbf16>,
    return
  }
  func.func @transform_0(%arg0: i32) -> (i32, i32) {
    %c0_i32 = arith.constant 0 : i32
    %c0_i32_0 = arith.constant 0 : i32
    %c0_i32_1 = arith.constant 0 : i32
    return %c0_i32, %c0_i32_0 : i32, i32
  }
  func.func @transform_1(%arg0: i32) -> (i32, i32) {
    %c0_i32 = arith.constant 0 : i32
    %c0_i32_0 = arith.constant 0 : i32
    %c0_i32_1 = arith.constant 0 : i32
    return %c0_i32, %c0_i32_0 : i32, i32
  }
  func.func @transform_2(%arg0: i32) -> (i32, i32) {
    %c0_i32 = arith.constant 0 : i32
    %c0_i32_0 = arith.constant 0 : i32
    %c0_i32_1 = arith.constant 0 : i32
    return %c0_i32, %c0_i32_0 : i32, i32
  }
  func.func @transform_3(%arg0: i32) -> (i32, i32) {
    %c0_i32 = arith.constant 0 : i32
    %c0_i32_0 = arith.constant 0 : i32
    %c0_i32_1 = arith.constant 0 : i32
    return %c0_i32, %c0_i32_0 : i32, i32
  }
}

</mosaic_0001>

<bundles_post_ra>
// kernel: tpu_custom_call.1
= control target key start
LH: loop header
LB: loop body
LE: loop exit
PB: predicated region body
PF: predicated region fallthrough
CT: control target
= control target key end

     0   :  { %8 = vsyncpa [#allocation3], 0  ;;  %s298_s0 = inlined_call_operand.hbm [shape: bf16[16,32], index: 0, kind: input, shape index: {}]   ;;  %s299_s1 = inlined_call_operand.hbm [shape: bf16[32,32], index: 1, kind: input, shape index: {}]   ;;  %s300_s2 = inlined_call_operand.vmem [shape: f32[1,32], index: 2, kind: input, shape index: {}]   ;;  %s301_s3 = inlined_call_operand.hbm [shape: bf16[16,32], index: 3, kind: output, shape index: {}]  }
   0x1   :  { %9 = vsyncpa [#allocation6], 0 }
   0x2   :  { %10 = vsyncpa [#allocation4], 0  ;;  %s250_s12 = smov [#allocation2]  }
   0x3   :  { %s16_s13 = sshll.u32 %s250_s12, 4  ;;  %s17_s13 = int_to_ptr.vmem [resolvable:$true] %s16_s13 }
   0x4   :  { %s192_s14 = scalar_lea.vmem %s17_s13, 128  ;;  %p197_p1 = scmp.lt.s32.totalorder %s17_s13, %s17_s13 }
   0x5   :  { %p193_p0 = scmp.ne.s32.totalorder %s17_s13, %s192_s14  ;;  %p198_p2 = scmp.lt.s32.totalorder %s192_s14, %s192_s14 }
   0x7   :  { %p199_p3 = por %p198_p2, %p197_p1 }
   0x9   :  { %p200_p4 = pnand %p199_p3, %p193_p0 }
   0xb   :  { %203 = shalt.err (!%p200_p4)
}
   0xc   :  { %s251_s15 = smov 64   ;;  %s252_s16 = smov 4  }
   0xd   :  { %22 = dma.hbm_to_vmem [thread:$0]  %s298_s0, 128, %s17_s13, [#allocation3], %s251_s15, %s251_s15, %s252_s16  }
   0xe   :  { %s253_s19 = smov [#allocation5]  }
   0xf   :  { %s28_s20 = sshll.u32 %s253_s19, 4  ;;  %s29_s20 = int_to_ptr.vmem [resolvable:$true] %s28_s20 }
  0x10   :  { %s212_s21 = scalar_lea.vmem %s29_s20, 256  ;;  %p217_p6 = scmp.lt.s32.totalorder %s29_s20, %s29_s20 }
  0x11   :  { %p213_p5 = scmp.ne.s32.totalorder %s29_s20, %s212_s21  ;;  %p218_p7 = scmp.lt.s32.totalorder %s212_s21, %s212_s21 }
  0x13   :  { %p219_p8 = por %p218_p7, %p217_p6 }
  0x15   :  { %p220_p9 = pnand %p219_p8, %p213_p5 }
  0x17   :  { %223 = shalt.err (!%p220_p9)
}
  0x18   :  { %34 = dma.hbm_to_vmem [thread:$0]  %s299_s1, 256, %s29_s20, [#allocation6], %s251_s15, %s251_s15, %s252_s16  }
  0x19   :  { %244 = dma.done.wait [#allocation3], 128  }
  0x1a   :  { %245 = vsyncadd [#allocation3], 4294967168 }
  0x1b   :  { %246 = dma.done.wait [#allocation6], 256  }
  0x1c   :  { %247 = vsyncadd [#allocation6], 4294967040  ;;  %v254_v0 = vmov 0.0   ;;  %vm255_vm0 = vmmov 0   ;;  %v177_v1 = vld [vmem:[#allocation5 + $0x8] sm:$0xff]   ;;  %v178_v2 = vld [vmem:[#allocation5] sm:$0xff]  }
  0x1d   :  { %162 = vmatprep.subr.bf16.mxu0 %v254_v0  ;;  %166 = vmatprep.mubr.msk.bf16.mxu0 %vm255_vm0, %v254_v0  ;;  %v179_v3 = vld [vmem:[#allocation2] sm:$0xff]   ;;  %vm74_vm1 = vcmask 261120   ;;  %vm129_vm2 = vcmask 257024   ;;  %s256_s1 = smov [#allocation7]  }
  0x1e   :  { %163 = vmatpush3.bf16.msra.mxu0 %v177_v1  ;;  %v150_v4 = vld [vmem:[%s300_s2] ss:$0 sm:$0xff]  ;;  %s137_s25 = sshll.u32 %s256_s1, 4  ;;  %s138_s25 = int_to_ptr.vmem [resolvable:$true] %s137_s25 }
  0x1f   :  { %164 = vmatprep.subr.bf16.mxu0 %v254_v0  ;;  %s224_s26 = scalar_lea.vmem %s138_s25, 128  ;;  %p229_p11 = scmp.lt.s32.totalorder %s138_s25, %s138_s25 }
  0x20   :  { %p225_p10 = scmp.ne.s32.totalorder %s138_s25, %s224_s26  ;;  %p230_p12 = scmp.lt.s32.totalorder %s224_s26, %s224_s26 }
  0x22   :  { %165 = vmatpush3.bf16.msra.mxu0 %v178_v2  ;;  %p231_p13 = por %p230_p12, %p229_p11 }
  0x24   :  { %p232_p0 = pnand %p231_p13, %p225_p10 }
  0x25   :  { %167 = vmatmul.mubr.msk.bf16.vlgmr.msra.gmra.mxu0 %vm74_vm1, %v179_v3 }
  0xe5   :  { %v112_v5 = vpop.f32.mrf.mxu0 }
  0xe6   :  { %v113_v6 = vadd.f32 %v150_v4, %v112_v5 }
  0xe7   :  { %v168_v7 = vpop.f32.mrf.mxu0 }
  0xe8   :  { %180 = vtanh.f32 %v113_v6 }
  0xe9   :  { %v115_v8 = vpop.f32.mrf.mxu0 }
  0xea   :  { %v116_v9 = vadd.f32 %v150_v4, %v115_v8 }
  0xeb   :  { %v169_v10 = vpop.f32.mrf.mxu0 }
  0xec   :  { %182 = vtanh.f32 %v116_v9 }
  0xf5   :  { %v181_v11 = vpop.eup %180 }
  0xf6   :  { %v157_v12 = vpack.c.bf16 %v181_v11, %v181_v11 }
  0xf8   :  { %130 = vst.msk [vmem:[#allocation7] sm:$0xf] %vm129_vm2, %v157_v12 }
  0xf9   :  { %v183_v13 = vpop.eup %182 }
  0xfa   :  { %v158_v14 = vpack.c.bf16 %v183_v13, %v183_v13 }
  0xfc   :  { %131 = vst.msk [vmem:[#allocation7 + $0x4] sm:$0xf] %vm129_vm2, %v158_v14 }
  0xfd   :  { %235 = shalt.err (!%p232_p0)
}
  0xfe   :  { %143 = dma.vmem_to_hbm [thread:$0]  %s138_s25, 128, %s301_s3, [#allocation4], %s251_s15, %s251_s15, %s252_s16  }
  0xff   :  { %248 = dma.done.wait [#allocation4], 128  }
 0x100   :  { %249 = vsyncadd [#allocation4], 4294967168 }
 0x101   :  { %147 = vsyncpa [#allocation3], 1 }
 0x102   :  { %148 = vsyncpa [#allocation6], 1 }
 0x103   :  { %149 = vsyncpa [#allocation4], 1 }

</bundles_post_ra>
